<compile_context>
chip_gen: v6e
topology: v6e:2x2x1
jax: 0.10.0
libtpu: 0.0.40
codegen_flags: <defaults>
</compile_context>

<pallas_src>
import functools

import jax
import jax.numpy as jnp
from jax.experimental import pallas as pl
from jax.experimental.pallas import tpu as pltpu


# ---------------------------------------------------------------------------
# Tile selection: largest tile <= max_tile that is a multiple of `align` and
# evenly divides `total`; falls back to the full extent (always legal because a
# block dim equal to the full array dim satisfies the (8,128) rule).
# ---------------------------------------------------------------------------
def _choose_tile(total, max_tile, align):
    if total <= max_tile:
        return total
    t = (max_tile // align) * align
    while t >= align:
        if total % t == 0:
            return t
        t -= align
    return total


# ---------------------------------------------------------------------------
# Kernel 1: non-zero mask  (torch.sum(p, dim=2).ne(0)) — planar layout.
# Whole batch per grid step (removes per-batch step overhead); tiled over N.
# ---------------------------------------------------------------------------
def _mask_kernel(pcT_ref, mask_ref):
    # pcT_ref:  (B, C, tm)  float32   (planar: lane dim = points)
    # mask_ref: (B, tm)     float32   (lane-dense 1.0 where coordinate-sum != 0)
    x = pcT_ref[...]                               # (B, C, tm)
    C = x.shape[1]
    s = x[:, 0, :]                                 # (B, tm) — pure VPU sublane adds
    for c in range(1, C):
        s = s + x[:, c, :]
    mask_ref[...] = jnp.where(s != 0.0, 1.0, 0.0)


def nonzero_mask(pcT):
    # pcT: (B, C, N) float32 -> (B, N) bool
    B, C, N = pcT.shape
    tm = _choose_tile(N, 2048, 128)
    out = pl.pallas_call(
        _mask_kernel,
        out_shape=jax.ShapeDtypeStruct((B, N), jnp.float32),
        grid=(N // tm,),
        in_specs=[pl.BlockSpec((B, C, tm), lambda i: (0, 0, i))],
        out_specs=pl.BlockSpec((B, tm), lambda i: (0, i)),
        compiler_params=pltpu.CompilerParams(
            dimension_semantics=("parallel",),
            vmem_limit_bytes=48 * 1024 * 1024,
        ),
    )(pcT)
    return out > 0.5


# ---------------------------------------------------------------------------
# Kernel 2: gather sampled points via TILED one-hot matmul.
#   grid = (B ["parallel"], n_points tiles ["parallel"], N tiles ["arbitrary"])
#   out[c, i] = sum_j pcT[c, j] * onehot[j, i]  accumulated over N tiles.
# Output is lane-dense (1, C, tn): full-width unmasked stores.
# ---------------------------------------------------------------------------
def _gather_kernel(idx_ref, pcT_ref, out_ref, acc_ref):
    # idx_ref: (1, 1, tn) int32   pcT_ref: (1, C, tk)   out_ref: (1, C, tn)
    # acc_ref: (C, tn) float32 VMEM scratch (accumulator across the N tiles)
    k = pl.program_id(2)

    @pl.when(k == 0)
    def _init():
        acc_ref[...] = jnp.zeros_like(acc_ref)

    tk = pcT_ref.shape[2]
    tn = idx_ref.shape[2]
    # One-hot built only for this (tk, tn) tile.  Shift the indices (a (1, tn)
    # subtract) instead of shifting the iota (a (tk, tn) add), and fold the
    # compare+cast into a single jnp.where producing the matmul dtype directly.
    col = jax.lax.broadcasted_iota(jnp.int32, (tk, tn), 0)          # col[j, i] = j
    local_idx = idx_ref[0] - k * tk                                 # (1, tn)
    onehot = jnp.where(col == local_idx, 1.0, 0.0)                  # (tk, tn) f32

    pts = pcT_ref[0].astype(jnp.float32)                            # (C, tk)
    acc_ref[...] += jax.lax.dot_general(
        pts, onehot, (((1,), (0,)), ((), ())),
        preferred_element_type=jnp.float32)                         # (C, tn)

    @pl.when(k == pl.num_programs(2) - 1)
    def _done():
        out_ref[0] = acc_ref[...].astype(out_ref.dtype)


def gather_points(pcT, idx, *, tn_max=1024, tk_max=512):
    # pcT: (B, C, N), idx: (B, n_points) -> (B, C, n_points)
    B, C, N = pcT.shape
    n_points = idx.shape[-1]
    tn = _choose_tile(n_points, tn_max, 128)
    tk = _choose_tile(N, tk_max, 128)
    idx3 = idx.reshape(B, 1, n_points).astype(jnp.int32)
    return pl.pallas_call(
        _gather_kernel,
        out_shape=jax.ShapeDtypeStruct((B, C, n_points), pcT.dtype),
        grid=(B, n_points // tn, N // tk),
        in_specs=[pl.BlockSpec((1, 1, tn), lambda b, n, k: (b, 0, n)),
                  pl.BlockSpec((1, C, tk), lambda b, n, k: (b, 0, k))],
        out_specs=pl.BlockSpec((1, C, tn), lambda b, n, k: (b, 0, n)),
        scratch_shapes=[pltpu.VMEM((C, tn), jnp.float32)],
        compiler_params=pltpu.CompilerParams(
            # n_points-tile axis is also parallel so small B doesn't idle a
            # v7x TensorCore; the N reduction axis is arbitrary and last.
            dimension_semantics=("parallel", "parallel", "arbitrary"),
            vmem_limit_bytes=48 * 1024 * 1024,
        ),
    )(idx3, pcT)


# ---------------------------------------------------------------------------
# JAX glue: random index selection (static shapes; mirrors the torch branch).
# Single argsort (permutation) + cumsum-based compaction (no second sort).
# Precondition (same as the torch reference): each cloud has >= 1 non-zero point.
# ---------------------------------------------------------------------------
def _sample_indices(key, mask, n_points):
    # mask: (N,) bool — which original positions hold non-zero points.
    N = mask.shape[0]
    n_pts = jnp.sum(mask.astype(jnp.int32))
    k_perm, k_rand = jax.random.split(key)

    # Case A (n_pts >= n_points): random permutation of the non-zero points
    # (zero points get key 2.0 > any uniform draw, so they are never selected).
    perm_keys = jnp.where(mask, jax.random.uniform(k_perm, (N,)), 2.0)
    idx_a = jnp.argsort(perm_keys)[:n_points]

    # Case B (n_pts < n_points): sample with replacement from the compacted
    # non-zero set.  order[c] = original index of the c-th non-zero point (in
    # original order, as torch boolean indexing gives), built with cumsum +
    # scatter instead of a second O(N log N) sort.
    pos = jnp.cumsum(mask.astype(jnp.int32)) - 1                 # compacted position
    order = jnp.zeros((N,), jnp.int32).at[
        jnp.where(mask, pos, N)].set(jnp.arange(N, dtype=jnp.int32), mode="drop")
    r = jax.random.randint(k_rand, (n_points,), 0, jnp.maximum(n_pts, 1))
    idx_b = order[r]

    return jnp.where(n_pts < n_points, idx_b, idx_a).astype(jnp.int32)


def random_point_sampling(pred_cloud, partial_cloud=None, *, n_points, key):
    if partial_cloud is not None:
        pred_cloud = jnp.concatenate([partial_cloud, pred_cloud], axis=1)
    B = pred_cloud.shape[0]
    # Planar layout once: (B, C, N) — lane-dense inside both Pallas kernels.
    pcT = jnp.transpose(pred_cloud, (0, 2, 1))
    mask = nonzero_mask(pcT)                                          # Pallas
    keys = jax.random.split(key, B)
    idx = jax.vmap(functools.partial(_sample_indices, n_points=n_points))(keys, mask)
    outT = gather_points(pcT, idx)                                    # Pallas
    return jnp.transpose(outT, (0, 2, 1))                             # (B, n_points, C)


# ---------------------------------------------------------------------------
if __name__ == "__main__":
    key = jax.random.PRNGKey(0)
    k_pred, k_part, k_samp = jax.random.split(key, 3)

    B, N_pred, N_part, C = 2, 96, 32, 3
    n_points = 64

    pred_cloud = jax.random.normal(k_pred, (B, N_pred, C), jnp.float32)
    partial_cloud = jax.random.normal(k_part, (B, N_part, C), jnp.float32)
    # Zero-pad some points so the non-zero filtering path is actually exercised.
    partial_cloud = partial_cloud.at[:, :8, :].set(0.0)

    out = random_point_sampling(pred_cloud, partial_cloud,
                                n_points=n_points, key=k_samp)
    out = jax.block_until_ready(out)

    assert out.shape == (B, n_points, C), out.shape
    assert out.dtype == pred_cloud.dtype
    # Every sampled point must come from the non-zero set.
    assert bool(jnp.all(jnp.sum(out, axis=2) != 0.0))

    print("KERNEL_OK")
</pallas_src>

<mosaic_0001>
module attributes {stable_mosaic.version = 11 : i64} {
  func.func @_mask_kernel(%arg0: i32, %arg1: memref<2x3x128xf32, #tpu.memory_space<vmem>>, %arg2: memref<2x128xf32, #tpu.memory_space<vmem>>) attributes {dimension_semantics = [#tpu.dimension_semantics<parallel>], iteration_bounds = array<i64: 1>, scalar_prefetch = 0 : i64, scratch_operands = 0 : i64, tpu.core_type = #tpu.core_type<tc>, window_params = [{transform_indices = @transform_0, window_bounds = array<i64: 2, 3, 128>}, {transform_indices = @transform_1, window_bounds = array<i64: 2, 128>}]} {
    %c0 = arith.constant 0 : index
    %c0_0 = arith.constant 0 : index
    %c0_1 = arith.constant 0 : index
    %0 = vector.load %arg1[%c0, %c0_0, %c0_1] : memref<2x3x128xf32, #tpu.memory_space<vmem>>, vector<2x3x128xf32>
    %1 = vector.extract_strided_slice %0 {offsets = [0, 0, 0], sizes = [2, 1, 128], strides = [1, 1, 1]} : vector<2x3x128xf32> to vector<2x1x128xf32>
    %2 = vector.shape_cast %1 : vector<2x1x128xf32> to vector<2x128xf32>
    %3 = vector.extract_strided_slice %0 {offsets = [0, 1, 0], sizes = [2, 1, 128], strides = [1, 1, 1]} : vector<2x3x128xf32> to vector<2x1x128xf32>
    %4 = vector.shape_cast %3 : vector<2x1x128xf32> to vector<2x128xf32>
    %5 = arith.addf %2, %4 : vector<2x128xf32>
    %6 = vector.extract_strided_slice %0 {offsets = [0, 2, 0], sizes = [2, 1, 128], strides = [1, 1, 1]} : vector<2x3x128xf32> to vector<2x1x128xf32>
    %7 = vector.shape_cast %6 : vector<2x1x128xf32> to vector<2x128xf32>
    %8 = arith.addf %5, %7 : vector<2x128xf32>
    %cst = arith.constant 0.000000e+00 : f32
    %9 = vector.broadcast %cst : f32 to vector<2x128xf32>
    %10 = arith.cmpf one, %8, %9 : vector<2x128xf32>
    %cst_2 = arith.constant 1.000000e+00 : f32
    %cst_3 = arith.constant 0.000000e+00 : f32
    %11 = vector.broadcast %cst_2 : f32 to vector<2x128xf32>
    %12 = vector.broadcast %cst_3 : f32 to vector<2x128xf32>
    %13 = arith.select %10, %11, %12 : vector<2x128xi1>, vector<2x128xf32>
    %c0_4 = arith.constant 0 : index
    %c0_5 = arith.constant 0 : index
    %14 = vector.load %arg2[%c0_4, %c0_5] : memref<2x128xf32, #tpu.memory_space<vmem>>, vector<2x128xf32>
    tpu.vector_store %arg2[%c0_4, %c0_5], %13 {strides = array<i32>} : memref<2x128xf32, #tpu.memory_space<vmem>>, vector<2x128xf32>,
    return
  }
  func.func @transform_0(%arg0: i32) -> (i32, i32, i32) {
    %c0_i32 = arith.constant 0 : i32
    %c0_i32_0 = arith.constant 0 : i32
    %c0_i32_1 = arith.constant 0 : i32
    return %c0_i32, %c0_i32_0, %arg0 : i32, i32, i32
  }
  func.func @transform_1(%arg0: i32) -> (i32, i32) {
    %c0_i32 = arith.constant 0 : i32
    %c0_i32_0 = arith.constant 0 : i32
    return %c0_i32, %arg0 : i32, i32
  }
}

</mosaic_0001>

<bundles_post_ra>
// kernel: tpu_custom_call.1
= control target key start
LH: loop header
LB: loop body
LE: loop exit
PB: predicated region body
PF: predicated region fallthrough
CT: control target
= control target key end

     0   :  { %s95_s0 = inlined_call_operand.vmem [shape: f32[2,3,128], index: 0, kind: input, shape index: {}]   ;;  %s96_s1 = inlined_call_operand.hbm [shape: f32[2,128], index: 1, kind: output, shape index: {}]  }
   0x1   :  { %v9_v0 = vld [vmem:[%s95_s0] sm:$0x7]  ;;  %v10_v1 = vld [vmem:[%s95_s0 + $0x4] sm:$0x7] }
   0x2   :  { %v13_v2 = vrot.slane %v9_v0, 1  ;;  %v14_v3 = vrot.slane %v10_v1, 1  ;;  %v19_v4 = vrot.slane %v9_v0, 2  ;;  %v20_v5 = vrot.slane %v10_v1, 2 }
   0x3   :  { %6 = vsyncpa [#allocation3], 0  ;;  %s74_s10 = smov [#allocation2]   ;;  %v75_v10 = vmov 0.0   ;;  %vm32_vm2 = vcmask 1041409  }
   0x4   :  { %v17_v6 = vadd.f32 %v13_v2, %v9_v0  ;;  %v18_v7 = vadd.f32 %v14_v3, %v10_v1  ;;  %s42_s11 = sshll.u32 %s74_s10, 4  ;;  %s43_s11 = int_to_ptr.vmem [resolvable:$true] %s42_s11 }
   0x5   :  { %s52_s0 = scalar_lea.vmem %s43_s11, 32  ;;  %p57_p1 = scmp.lt.s32.totalorder %s43_s11, %s43_s11 }
   0x6   :  { %v23_v8 = vadd.f32 %v19_v4, %v17_v6  ;;  %v24_v9 = vadd.f32 %v20_v5, %v18_v7  ;;  %p53_p0 = scmp.ne.s32.totalorder %s43_s11, %s52_s0  ;;  %p58_p2 = scmp.lt.s32.totalorder %s52_s0, %s52_s0 }
   0x8   :  { %vm25_vm0 = vcmp.ne.f32.partialorder %v23_v8, 0.0  ;;  %vm26_vm1 = vcmp.ne.f32.partialorder %v24_v9, 0.0  ;;  %p59_p3 = por %p58_p2, %p57_p1 }
   0x9   :  { %v27_v11 = vsel %vm25_vm0, 1.0, %v75_v10  ;;  %v28_v12 = vsel %vm26_vm1, 1.0, %v75_v10 }
   0xa   :  { %v31_v13 = vrot.slane %v28_v12, 7  ;;  %p60_p4 = pnand %p59_p3, %p53_p0 }
   0xc   :  { %v33_v14 = vsel %vm32_vm2, %v31_v13, %v27_v11 }
   0xd   :  { %35 = vst [vmem:[#allocation2] sm:$0x3] %v33_v14 }
   0xe   :  { %63 = shalt.err (!%p60_p4)
}
   0xf   :  { %45 = dma.vmem_to_hbm [thread:$0]  %s43_s11, 32, %s96_s1, [#allocation3]  }
  0x10   :  { %72 = dma.done.wait [#allocation3], 32  }
  0x11   :  { %73 = vsyncadd [#allocation3], 4294967264 }
  0x12   :  { %49 = vsyncpa [#allocation3], 1 }

</bundles_post_ra>
